<compile_context>
chip_gen: v6e
topology: v6e:2x2x1
jax: 0.10.0
libtpu: 0.0.40
codegen_flags: <defaults>
</compile_context>

<pallas_src>
import jax
import jax.numpy as jnp
from jax import lax
from jax.experimental import pallas as pl
from jax.experimental.pallas import tpu as pltpu


def make_outconv_kernel(rows_out):
    def kernel(x_ref, m_ref, o_ref):
        # x_ref: (rows_out + 2, K) bf16   row slab: NB images x (H+2) padded rows, (c,w) on lanes
        # m_ref: (3, K, W*4) bf16         folded block-banded weights (grid-invariant, VMEM)
        # o_ref: (rows_out + 2, W*4) f32  output slab; the 2 trailing rows of the tile are unused
        acc = jnp.dot(x_ref[0:rows_out, :], m_ref[0],
                      preferred_element_type=jnp.float32)
        acc = acc + jnp.dot(x_ref[1:rows_out + 1, :], m_ref[1],
                            preferred_element_type=jnp.float32)
        acc = acc + jnp.dot(x_ref[2:rows_out + 2, :], m_ref[2],
                            preferred_element_type=jnp.float32)
        o_ref[0:rows_out, :] = acc

    return kernel


def fold_weights(Wt, bias_t, Wc, bias_c, W):
    """Fold (ConvTranspose2d weight/bias, Conv2d weight/bias) into banded matmul operands.

    Wt: (Cin, Cout, 2, 2)   bias_t: (Cout,)   Wc: (1, Cout, 3, 3)   bias_c: (1,)
    Returns M: (3, Caug*(W+2), W*4) bf16 with Caug = Cin + 2 and K packed (channel, w_pad)-major.
    """
    Cin, Cout = Wt.shape[0], Wt.shape[1]
    Caug = Cin + 2
    Wp = W + 2
    # Channel Cin   : deconv-bias carrier (weight = bias_t at every 2x2 tap)
    # Channel Cin+1 : conv-bias carrier (zero weight through the deconv path; bias_c added below)
    Wt_aug = jnp.concatenate(
        [Wt,
         jnp.broadcast_to(bias_t[None, :, None, None], (1, Cout, 2, 2)),
         jnp.zeros((1, Cout, 2, 2), Wt.dtype)], axis=0)                 # (Caug, Cout, 2, 2)

    # Weff[dh, dw, c, a*2+b]: exact 3x3-conv-on-x equivalent of (deconv k2 s2 -> conv 3x3 pad 1).
    Weff = jnp.zeros((3, 3, Caug, 4), jnp.float32)
    for a in range(2):
        for b in range(2):
            q = a * 2 + b
            for kh in range(3):
                for kw in range(3):
                    dh, rh = divmod(a + kh - 1, 2)    # floor div/mod handles the -1 tap
                    dw, rw = divmod(b + kw - 1, 2)
                    contrib = Wt_aug[:, :, rh, rw] @ Wc[0, :, kh, kw]   # (Caug,)
                    Weff = Weff.at[dh + 1, dw + 1, :, q].add(contrib)
    # Conv bias on a single tap of the all-ones channel -> added exactly once per output.
    Weff = Weff.at[1, 1, Cin + 1, :].add(bias_c[0])

    # Block-banded matrices: M[dh, c*Wp + (w+dw), w*4 + q] = Weff[dh, dw, c, q]
    eyeW = jnp.eye(W, dtype=jnp.float32)
    bands = []
    for dhp in range(3):
        band = jnp.zeros((Caug, Wp, W, 4), jnp.float32)
        for dwp in range(3):
            diag = jnp.einsum('uv,cq->cuvq', eyeW, Weff[dhp, dwp])      # (Caug, W, W, 4)
            band = band + jnp.pad(diag, ((0, 0), (dwp, 2 - dwp), (0, 0), (0, 0)))
        bands.append(band.reshape(Caug * Wp, W * 4))
    return jnp.stack(bands, axis=0).astype(jnp.bfloat16)


def pick_batch_tile(n, rows_per_img, target_rows=128):
    """Images per grid step: target ~128 matmul rows (MXU fill, <=16 f32 acc vregs) with a legal,
    even row tiling (block row-dim divisible by 8, or a single tile spanning the full axis)."""
    nb = max(1, min(n, target_rows // rows_per_img))
    while nb > 1 and (n % nb != 0 or (nb * rows_per_img) % 8 != 0):
        nb -= 1
    if n % nb != 0 or (nb < n and (nb * rows_per_img) % 8 != 0):
        nb = n
    return nb


def outconv_pallas(x, Wt, bias_t, Wc, bias_c):
    N, Cin, H, W = x.shape
    Caug = Cin + 2
    Hp, Wp = H + 2, W + 2
    K = Caug * Wp
    WL = W * 4

    # Input prep: spatial zero-pad, append the two bias-carrier channels, pack (channel, w_pad)
    # on the lane axis.  The (c, w)-major packing keeps W minor so only the C/H axes swap
    # (cheaper relayout than a full NCHW->NHWC transpose).
    xp = jnp.pad(x.astype(jnp.float32), ((0, 0), (0, 0), (1, 1), (1, 1)))
    ones_in = jnp.pad(jnp.ones((N, 1, H, W), jnp.float32),
                      ((0, 0), (0, 0), (1, 1), (1, 1)))                 # 0 in the halo
    ones_all = jnp.ones((N, 1, Hp, Wp), jnp.float32)                    # 1 everywhere
    xa = jnp.concatenate([xp, ones_in, ones_all], axis=1)               # (N, Caug, Hp, Wp)
    xmat = jnp.transpose(xa, (0, 2, 1, 3)).reshape(N * Hp, K).astype(jnp.bfloat16)

    Mb = fold_weights(Wt, bias_t, Wc, bias_c, W)                        # (3, K, WL) bf16

    nb = pick_batch_tile(N, Hp)
    rows_blk = nb * Hp
    rows_out = rows_blk - 2
    n_tiles = N // nb

    kernel = make_outconv_kernel(rows_out)
    ymat = pl.pallas_call(
        kernel,
        out_shape=jax.ShapeDtypeStruct((N * Hp, WL), jnp.float32),
        grid=(n_tiles,),
        in_specs=[
            pl.BlockSpec((rows_blk, K), lambda t: (t, 0)),              # batch-tile row slab
            pl.BlockSpec(memory_space=pltpu.MemorySpace.VMEM),          # grid-invariant weights
        ],
        out_specs=pl.BlockSpec((rows_blk, WL), lambda t: (t, 0)),
        compiler_params=pltpu.CompilerParams(dimension_semantics=("parallel",)),
    )(xmat, Mb)

    # Valid slab rows are n*(H+2)+h, h in [0, H); last axis is packed (w, a, b).
    y = ymat.reshape(N, Hp, W, 2, 2)[:, :H]                             # (N, H, W, 2, 2)
    y = jnp.transpose(y, (0, 1, 3, 2, 4)).reshape(N, 1, 2 * H, 2 * W)
    return y


def outconv_reference(x, Wt, bias_t, Wc, bias_c):
    """Plain-JAX forward matching the PyTorch module (independent of the folding)."""
    N, Cin, H, W = x.shape
    Cout = Wt.shape[1]
    xh = jnp.transpose(x, (0, 2, 3, 1)).astype(jnp.float32)             # NHWC
    # ConvTranspose2d(k=2, s=2): each input pixel -> disjoint 2x2 output block
    up = jnp.einsum('nhwc,cmab->nhawbm', xh, Wt).reshape(N, 2 * H, 2 * W, Cout) + bias_t
    # Conv2d(Cout -> 1, 3x3, padding=1)
    wc_hwio = jnp.transpose(Wc, (2, 3, 1, 0))                           # (3,3,Cout,1)
    y = lax.conv_general_dilated(up, wc_hwio, (1, 1), 'SAME',
                                 dimension_numbers=('NHWC', 'HWIO', 'NHWC')) + bias_c
    return jnp.transpose(y, (0, 3, 1, 2))                               # (N, 1, 2H, 2W)


if __name__ == "__main__":
    # W=32 makes the output lane width W*4 = 128 (fully dense, unmasked stores).
    N, Cin, Cout, H, W = 2, 4, 8, 16, 32

    key = jax.random.PRNGKey(0)
    k_x, k_wt, k_bt, k_wc, k_bc = jax.random.split(key, 5)
    x = jax.random.normal(k_x, (N, Cin, H, W), jnp.float32)
    Wt = 0.3 * jax.random.normal(k_wt, (Cin, Cout, 2, 2), jnp.float32)  # ConvTranspose2d weight
    bias_t = 0.1 * jax.random.normal(k_bt, (Cout,), jnp.float32)        # ConvTranspose2d bias
    Wc = 0.2 * jax.random.normal(k_wc, (1, Cout, 3, 3), jnp.float32)    # Conv2d weight
    bias_c = 0.1 * jax.random.normal(k_bc, (1,), jnp.float32)           # Conv2d bias

    out = jax.block_until_ready(outconv_pallas(x, Wt, bias_t, Wc, bias_c))
    ref = jax.block_until_ready(outconv_reference(x, Wt, bias_t, Wc, bias_c))

    assert out.shape == (N, 1, 2 * H, 2 * W)
    # Tolerance reflects bf16 rounding of activations / folded weights (accumulation is f32).
    max_err = float(jnp.max(jnp.abs(out - ref)))
    assert jnp.allclose(out, ref, atol=5e-2, rtol=5e-2), max_err
    print("KERNEL_OK")
</pallas_src>

<mosaic_0001>
module attributes {stable_mosaic.version = 11 : i64} {
  func.func @kernel(%arg0: i32, %arg1: memref<36x204xbf16, #tpu.memory_space<vmem>>, %arg2: memref<3x204x128xbf16, #tpu.memory_space<vmem>>, %arg3: memref<36x128xf32, #tpu.memory_space<vmem>>) attributes {dimension_semantics = [#tpu.dimension_semantics<parallel>], iteration_bounds = array<i64: 1>, scalar_prefetch = 0 : i64, scratch_operands = 0 : i64, tpu.core_type = #tpu.core_type<tc>, window_params = [{transform_indices = @transform_0, window_bounds = array<i64: 36, 204>}, {pipeline_mode = #tpu.pipeline_mode<synchronous>, transform_indices = @transform_1, window_bounds = array<i64: 3, 204, 128>}, {transform_indices = @transform_2, window_bounds = array<i64: 36, 128>}]} {
    %c0 = arith.constant 0 : index
    %c0_0 = arith.constant 0 : index
    %0 = vector.load %arg1[%c0, %c0_0] : memref<36x204xbf16, #tpu.memory_space<vmem>>, vector<34x204xbf16>
    %c0_1 = arith.constant 0 : index
    %c0_2 = arith.constant 0 : index
    %c0_3 = arith.constant 0 : index
    %1 = vector.load %arg2[%c0_1, %c0_2, %c0_3] : memref<3x204x128xbf16, #tpu.memory_space<vmem>>, vector<1x204x128xbf16>
    %2 = vector.shape_cast %1 : vector<1x204x128xbf16> to vector<204x128xbf16>
    %cst = arith.constant dense<0.000000e+00> : vector<34x128xf32>
    %3 = tpu.matmul %0, %2, %cst {dimension_numbers = #tpu.dot_dimension_numbers<[1], [0], [0], [1], [0, 0, 1, 1], [], []>} : vector<34x204xbf16>, vector<204x128xbf16>, vector<34x128xf32> -> vector<34x128xf32>
    %c1 = arith.constant 1 : index
    %c0_4 = arith.constant 0 : index
    %4 = vector.load %arg1[%c1, %c0_4] : memref<36x204xbf16, #tpu.memory_space<vmem>>, vector<34x204xbf16>
    %c1_5 = arith.constant 1 : index
    %c0_6 = arith.constant 0 : index
    %c0_7 = arith.constant 0 : index
    %5 = vector.load %arg2[%c1_5, %c0_6, %c0_7] : memref<3x204x128xbf16, #tpu.memory_space<vmem>>, vector<1x204x128xbf16>
    %6 = vector.shape_cast %5 : vector<1x204x128xbf16> to vector<204x128xbf16>
    %cst_8 = arith.constant dense<0.000000e+00> : vector<34x128xf32>
    %7 = tpu.matmul %4, %6, %cst_8 {dimension_numbers = #tpu.dot_dimension_numbers<[1], [0], [0], [1], [0, 0, 1, 1], [], []>} : vector<34x204xbf16>, vector<204x128xbf16>, vector<34x128xf32> -> vector<34x128xf32>
    %8 = arith.addf %3, %7 : vector<34x128xf32>
    %c2 = arith.constant 2 : index
    %c0_9 = arith.constant 0 : index
    %9 = vector.load %arg1[%c2, %c0_9] : memref<36x204xbf16, #tpu.memory_space<vmem>>, vector<34x204xbf16>
    %c2_10 = arith.constant 2 : index
    %c0_11 = arith.constant 0 : index
    %c0_12 = arith.constant 0 : index
    %10 = vector.load %arg2[%c2_10, %c0_11, %c0_12] : memref<3x204x128xbf16, #tpu.memory_space<vmem>>, vector<1x204x128xbf16>
    %11 = vector.shape_cast %10 : vector<1x204x128xbf16> to vector<204x128xbf16>
    %cst_13 = arith.constant dense<0.000000e+00> : vector<34x128xf32>
    %12 = tpu.matmul %9, %11, %cst_13 {dimension_numbers = #tpu.dot_dimension_numbers<[1], [0], [0], [1], [0, 0, 1, 1], [], []>} : vector<34x204xbf16>, vector<204x128xbf16>, vector<34x128xf32> -> vector<34x128xf32>
    %13 = arith.addf %8, %12 : vector<34x128xf32>
    %c0_14 = arith.constant 0 : index
    %c0_15 = arith.constant 0 : index
    %14 = vector.load %arg3[%c0_14, %c0_15] : memref<36x128xf32, #tpu.memory_space<vmem>>, vector<34x128xf32>
    tpu.vector_store %arg3[%c0_14, %c0_15], %13 {strides = array<i32>} : memref<36x128xf32, #tpu.memory_space<vmem>>, vector<34x128xf32>,
    return
  }
  func.func @transform_0(%arg0: i32) -> (i32, i32) {
    %c0_i32 = arith.constant 0 : i32
    %c0_i32_0 = arith.constant 0 : i32
    return %arg0, %c0_i32 : i32, i32
  }
  func.func @transform_1(%arg0: i32) -> (i32, i32, i32) {
    %c0_i32 = arith.constant 0 : i32
    %c0_i32_0 = arith.constant 0 : i32
    %c0_i32_1 = arith.constant 0 : i32
    %c0_i32_2 = arith.constant 0 : i32
    return %c0_i32, %c0_i32_0, %c0_i32_1 : i32, i32, i32
  }
  func.func @transform_2(%arg0: i32) -> (i32, i32) {
    %c0_i32 = arith.constant 0 : i32
    %c0_i32_0 = arith.constant 0 : i32
    return %arg0, %c0_i32 : i32, i32
  }
}

</mosaic_0001>

<bundles_post_ra>
// kernel: tpu_custom_call.1
= control target key start
LH: loop header
LB: loop body
LE: loop exit
PB: predicated region body
PF: predicated region fallthrough
CT: control target
= control target key end

     0   :  { %7 = vsyncpa [#allocation3], 0  ;;  %s1039_s0 = inlined_call_operand.hbm [shape: bf16[36,204], index: 0, kind: input, shape index: {}]   ;;  %s1040_s1 = inlined_call_operand.hbm [shape: bf16[3,204,128], index: 1, kind: input, shape index: {}]   ;;  %s1041_s2 = inlined_call_operand.hbm [shape: f32[36,128], index: 2, kind: output, shape index: {}]  }
   0x1   :  { %8 = vsyncpa [#allocation6], 0 }
   0x2   :  { %9 = vsyncpa [#allocation4], 0  ;;  %s897_s9 = smov [#allocation2]  }
   0x3   :  { %s15_s10 = sshll.u32 %s897_s9, 4  ;;  %s16_s10 = int_to_ptr.vmem [resolvable:$true] %s15_s10 }
   0x4   :  { %s839_s11 = scalar_lea.vmem %s16_s10, 640  ;;  %p844_p1 = scmp.lt.s32.totalorder %s16_s10, %s16_s10 }
   0x5   :  { %p840_p0 = scmp.ne.s32.totalorder %s16_s10, %s839_s11  ;;  %p845_p2 = scmp.lt.s32.totalorder %s839_s11, %s839_s11 }
   0x7   :  { %p846_p3 = por %p845_p2, %p844_p1 }
   0x9   :  { %p847_p4 = pnand %p846_p3, %p840_p0 }
   0xb   :  { %850 = shalt.err (!%p847_p4)
}
   0xc   :  { %s898_s12 = smov 128   ;;  %s899_s13 = smov 8  }
   0xd   :  { %21 = dma.hbm_to_vmem [thread:$0]  %s1039_s0, 640, %s16_s10, [#allocation3], %s898_s12, %s898_s12, %s899_s13  }
   0xe   :  { %s900_s16 = smov [#allocation5]  }
   0xf   :  { %s27_s17 = sshll.u32 %s900_s16, 4  ;;  %s28_s17 = int_to_ptr.vmem [resolvable:$true] %s27_s17 }
  0x10   :  { %s859_s18 = scalar_lea.vmem %s28_s17, 4992  ;;  %p864_p6 = scmp.lt.s32.totalorder %s28_s17, %s28_s17 }
  0x11   :  { %p860_p5 = scmp.ne.s32.totalorder %s28_s17, %s859_s18  ;;  %p865_p7 = scmp.lt.s32.totalorder %s859_s18, %s859_s18 }
  0x13   :  { %p866_p8 = por %p865_p7, %p864_p6 }
  0x15   :  { %p867_p9 = pnand %p866_p8, %p860_p5 }
  0x17   :  { %870 = shalt.err (!%p867_p9)
}
  0x18   :  { %s901_s19 = smov 64   ;;  %s902_s20 = smov 4  }
  0x19   :  { %33 = dma.hbm_to_vmem [thread:$0]  %s1040_s1, 4992, %s28_s17, [#allocation6], %s901_s19, %s901_s19, %s902_s20  }
  0x1a   :  { %891 = dma.done.wait [#allocation3], 640  }
  0x1b   :  { %892 = vsyncadd [#allocation3], 4294966656 }
  0x1c   :  { %893 = dma.done.wait [#allocation6], 4992  }
  0x1d   :  { %894 = vsyncadd [#allocation6], 4294962304  ;;  %v903_v0 = vmov 0   ;;  %v781_v1 = vld [vmem:[#allocation5 + $0xa0] sm:$0xff]   ;;  %v782_v2 = vld [vmem:[#allocation5 + $0x38] sm:$0xff]   ;;  %vm248_vm0 = vcmask 621568  }
  0x1e   :  { %262 = vmatprep.subr.bf16.mxu0 %v903_v0  ;;  %413 = vmatprep.subr.bf16.mxu1 %v903_v0  ;;  %v783_v3 = vld [vmem:[#allocation5 + $0x98] sm:$0xff]   ;;  %v784_v4 = vld [vmem:[#allocation5 + $0x30] sm:$0xff]   ;;  %v786_v6 = vld [vmem:[#allocation5 + $0x28] sm:$0xff]   ;;  %vm258_vm1 = vcmask 1045504   ;;  %vm121_vm2 = vsmask.f32 7424 }
  0x1f   :  { %263 = vmatpush1.bf16.msra.mxu0 %v781_v1  ;;  %414 = vmatpush1.bf16.msra.mxu1 %v782_v2  ;;  %v785_v5 = vld [vmem:[#allocation5 + $0x90] sm:$0xff]   ;;  %v787_v7 = vld [vmem:[#allocation5 + $0x88] sm:$0xff]   ;;  %v788_v8 = vld [vmem:[#allocation5 + $0x20] sm:$0xff]   ;;  %vm502_vm3 = vcmask 1046528   ;;  %s904_s0 = smov [#allocation7]  }
  0x20   :  { %264 = vmatprep.subr.bf16.mxu0 %v903_v0  ;;  %415 = vmatprep.subr.bf16.mxu1 %v903_v0  ;;  %v789_v9 = vld [vmem:[#allocation5 + $0x80] sm:$0xff]   ;;  %v790_v10 = vld [vmem:[#allocation5 + $0x18] sm:$0xff]   ;;  %v792_v12 = vld [vmem:[#allocation5 + $0x10] sm:$0xff]   ;;  %s676_s1 = sshll.u32 %s904_s0, 4  ;;  %s677_s1 = int_to_ptr.vmem [resolvable:$true] %s676_s1 }
  0x21   :  { %v791_v11 = vld [vmem:[#allocation5 + $0x78] sm:$0xff]   ;;  %v793_v13 = vld [vmem:[#allocation5 + $0x70] sm:$0xff]   ;;  %v794_v14 = vld [vmem:[#allocation5 + $0x8] sm:$0xff]   ;;  %s871_s23 = scalar_lea.vmem %s677_s1, 640  ;;  %p876_p11 = scmp.lt.s32.totalorder %s677_s1, %s677_s1 }
  0x22   :  { %v795_v15 = vld [vmem:[#allocation5 + $0x68] sm:$0xff]   ;;  %v41_v17 = vld [vmem:[#allocation2] sm:$0xff]  ;;  %v943_v18 = vld [vmem:[#allocation2 + $0x8] sm:$0xff]  ;;  %p872_p10 = scmp.ne.s32.totalorder %s677_s1, %s871_s23  ;;  %p877_p12 = scmp.lt.s32.totalorder %s871_s23, %s871_s23 }
  0x23   :  { %265 = vmatpush1.bf16.msra.mxu0 %v783_v3  ;;  %416 = vmatpush1.bf16.msra.mxu1 %v784_v4  ;;  %v797_v16 = vld [vmem:[#allocation5 + $0xc8] sm:$0x3f]   ;;  %v796_v19 = vld [vmem:[#allocation5] sm:$0xff]   ;;  %v690_v20 = vcombine.high %v41_v17, %v943_v18  ;;  %v689_v32 = vcombine.low %v41_v17, %v943_v18  ;;  %v800_v33 = vld [vmem:[#allocation5 + $0x58] sm:$0xff]  }
  0x24   :  { %266 = vmatprep.subr.bf16.mxu0 %v903_v0  ;;  %417 = vmatprep.subr.bf16.mxu1 %v903_v0  ;;  %v947_v21 = vld [vmem:[#allocation2 + $0x14] ss:$8 sps:$4 sm:$0xff]   ;;  %v798_v22 = vld [vmem:[#allocation5 + $0x60] sm:$0x3f]   ;;  %v260_v26 = vsel %vm258_vm1, %v797_v16, 0  ;;  %v801_v35 = vld [vmem:[#allocation5 + $0xb8] sm:$0xff]   ;;  %p878_p13 = por %p877_p12, %p876_p11 }
  0x25   :  { %v135_v23 = vshrl.u32 %v690_v20, 16  ;;  %v137_v24 = vshll.u32 %v690_v20, 16  ;;  %v142_v25 = vshll.u32 %v947_v21, 16  ;;  %726 = vmatprep.mubr.msk.bf16.mxu1 %vm248_vm0, %v690_v20  ;;  %v411_v29 = vsel %vm258_vm1, %v798_v22, 0  ;;  %v799_v31 = vld [vmem:[#allocation5 + $0xc0] sm:$0xff]   ;;  %v802_v36 = vld [vmem:[#allocation5 + $0x50] sm:$0xff]  }
  0x26   :  { %v961_v37 = vld [vmem:[#allocation2 + $0x10] ss:$8 sps:$4 sm:$0xff]   ;;  %v125_v38 = vshll.u32 %v689_v32, 16  ;;  %v72_v39 = vld [vmem:[#allocation2 + $0x20] sm:$0x33]  ;;  %v123_v41 = vshrl.u32 %v689_v32, 16  ;;  %p879_p0 = pnand %p878_p13, %p872_p10 }
  0x27   :  { %267 = vmatpush1.bf16.msra.mxu0 %v785_v5  ;;  %418 = vmatpush1.bf16.msra.mxu1 %v786_v6  ;;  %v139_v27 = vrot.slane %v137_v24, 1  ;;  %v144_v28 = vrot.slane %v142_v25, 1  ;;  %v803_v40 = vld [vmem:[#allocation5 + $0xb0] sm:$0xff]   ;;  %v130_v43 = vshll.u32 %v961_v37, 16  ;;  %v966_v44 = vcombine.high %v72_v39, %v72_v39  ;;  %v804_v45 = vld [vmem:[#allocation5 + $0x48] sm:$0xff]   ;;  %v806_v52 = vld [vmem:[#allocation5 + $0x40] sm:$0xff]  }
  0x28   :  { %268 = vmatprep.subr.bf16.mxu0 %v903_v0  ;;  %419 = vmatprep.subr.bf16.mxu1 %v903_v0  ;;  %v127_v42 = vrot.slane %v125_v38, 1  ;;  %v154_v46 = vshrl.u32 %v947_v21, 16  ;;  %v805_v47 = vld [vmem:[#allocation5 + $0xa8] sm:$0xff]   ;;  %v972_v51 = vcombine.low %v72_v39, %v72_v39  ;;  %v146_v57 = vshrl.u32 %v961_v37, 16  ;;  %v813_v59 = vld [vmem:[#allocation5 + $0x100] sm:$0xff]   ;;  %v814_v2 = vld [vmem:[#allocation5 + $0xf8] sm:$0xff]  }
  0x29   :  { %v140_v30 = vor.u32 %v139_v27, %v135_v23  ;;  %v132_v49 = vrot.slane %v130_v43, 1  ;;  %v158_v50 = vshll.u32 %v966_v44, 16  ;;  %v812_v55 = vld [vmem:[#allocation5 + $0x108] sm:$0xff]   ;;  %v45_v63 = vld [vmem:[#allocation2 + $0x20] sm:$0x11]  ;;  %v165_v1 = vshrl.u32 %v966_v44, 16 }
  0x2a   :  { %v128_v48 = vor.u32 %v127_v42, %v123_v41  ;;  %v156_v53 = vor.u32 %v154_v46, %v144_v28  ;;  %v150_v58 = vshll.u32 %v972_v51, 16  ;;  %v989_v4 = vld [vmem:[#allocation2] sm:$0xee]  ;;  %v712_v5 = vcombine.high %v45_v63, %v45_v63  ;;  %v817_v17 = vld [vmem:[#allocation5 + $0xe0] sm:$0xff]   ;;  %v822_v22 = vld [vmem:[#allocation5 + $0x130] sm:$0x3f]  }
  0x2b   :  { %269 = vmatpush1.bf16.msra.mxu0 %v787_v7  ;;  %420 = vmatpush1.bf16.msra.mxu1 %v788_v8  ;;  %v145_v34 = vsel %vm121_vm2, %v140_v30, %v144_v28  ;;  %v160_v56 = vrot.slane %v158_v50, 1  ;;  %v148_v61 = vor.u32 %v146_v57, %v132_v49  ;;  %v162_v7 = vshrl.u32 %v972_v51, 16  ;;  %v818_v20 = vld [vmem:[#allocation5 + $0xd8] sm:$0xff]   ;;  %v824_v24 = vld [vmem:[#allocation5 + $0x128] sm:$0xff]   ;;  %v826_v25 = vld [vmem:[#allocation5 + $0x120] sm:$0xff]  }
  0x2c   :  { %270 = vmatprep.subr.bf16.mxu0 %v903_v0  ;;  %421 = vmatprep.subr.bf16.mxu1 %v903_v0  ;;  %v133_v54 = vsel %vm121_vm2, %v128_v48, %v132_v49  ;;  %v152_v62 = vrot.slane %v150_v58, 1  ;;  %v730_v8 = vcombine.high %v989_v4, %v943_v18  ;;  %v603_v23 = vsel %vm258_vm1, %v822_v22, 0  ;;  %v828_v28 = vld [vmem:[#allocation5 + $0x110] sm:$0xff]  }
  0x2d   :  { %708 = vmatprep.mubr.msk.bf16.mxu0 %vm248_vm0, %v145_v34  ;;  %v161_v60 = vsel %vm121_vm2, %v156_v53, %v160_v56  ;;  %v167_v6 = vor.u32 %v165_v1, %v160_v56  ;;  %v729_v27 = vcombine.low %v989_v4, %v943_v18  ;;  %v504_v30 = vrot.slane %v961_v37, 1 }
  0x2e   :  { %v153_v3 = vsel %vm121_vm2, %v148_v61, %v152_v62 }
  0x2f   :  { %271 = vmatpush1.bf16.msra.mxu0 %v789_v9  ;;  %422 = vmatpush1.bf16.msra.mxu1 %v790_v10  ;;  %v815_v9 = vld [vmem:[#allocation5 + $0xf0] sm:$0xff]   ;;  %v164_v10 = vor.u32 %v162_v7, %v152_v62 }
  0x30   :  { %272 = vmatprep.subr.bf16.mxu0 %v903_v0  ;;  %423 = vmatprep.subr.bf16.mxu1 %v903_v0 }
  0x33   :  { %273 = vmatpush1.bf16.msra.mxu0 %v791_v11  ;;  %424 = vmatpush1.bf16.msra.mxu1 %v792_v12  ;;  %v506_v11 = vrot.slane %v730_v8, 1  ;;  %v507_v12 = vrot.slane %v947_v21, 1 }
  0x34   :  { %274 = vmatprep.subr.bf16.mxu0 %v903_v0  ;;  %425 = vmatprep.subr.bf16.mxu1 %v903_v0 }
  0x35   :  { %v508_v16 = vsel %vm502_vm3, %v506_v11, %v507_v12 }
  0x37   :  { %275 = vmatpush1.bf16.msra.mxu0 %v793_v13  ;;  %426 = vmatpush1.bf16.msra.mxu1 %v794_v14  ;;  %v816_v13 = vld [vmem:[#allocation5 + $0xe8] sm:$0xff]   ;;  %v711_v14 = vcombine.low %v45_v63, %v45_v63 }
  0x38   :  { %276 = vmatprep.subr.bf16.mxu0 %v903_v0  ;;  %427 = vmatprep.subr.bf16.mxu1 %v903_v0 }
  0x3b   :  { %277 = vmatpush1.bf16.msra.mxu0 %v795_v15  ;;  %428 = vmatpush1.bf16.msra.mxu1 %v796_v19  ;;  %v511_v15 = vrot.slane %v966_v44, 1 }
  0x3c   :  { %284 = vmatprep.subr.bf16.mxu0 %v903_v0  ;;  %435 = vmatprep.subr.bf16.mxu1 %v903_v0 }
  0x3d   :  { %v512_v19 = vsel %vm502_vm3, %v507_v12, %v511_v15 }
  0x3f   :  { %285 = vmatpush2.bf16.msra.mxu0 %v260_v26  ;;  %436 = vmatpush2.bf16.msra.mxu1 %v411_v29  ;;  %v827_v26 = vld [vmem:[#allocation5 + $0x118] sm:$0xff]   ;;  %v503_v29 = vrot.slane %v729_v27, 1 }
  0x40   :  { %286 = vmatprep.subr.bf16.mxu0 %v903_v0  ;;  %437 = vmatprep.subr.bf16.mxu1 %v903_v0 }
  0x41   :  { %v505_v18 = vsel %vm502_vm3, %v503_v29, %v504_v30 }
  0x43   :  { %287 = vmatpush2.bf16.msra.mxu0 %v799_v31  ;;  %438 = vmatpush2.bf16.msra.mxu1 %v800_v33  ;;  %v509_v31 = vrot.slane %v972_v51, 1 }
  0x44   :  { %288 = vmatprep.subr.bf16.mxu0 %v903_v0  ;;  %439 = vmatprep.subr.bf16.mxu1 %v903_v0 }
  0x47   :  { %289 = vmatpush2.bf16.msra.mxu0 %v801_v35  ;;  %440 = vmatpush2.bf16.msra.mxu1 %v802_v36 }
  0x48   :  { %290 = vmatprep.subr.bf16.mxu0 %v903_v0  ;;  %441 = vmatprep.subr.bf16.mxu1 %v903_v0 }
  0x4b   :  { %291 = vmatpush2.bf16.msra.mxu0 %v803_v40  ;;  %442 = vmatpush2.bf16.msra.mxu1 %v804_v45 }
  0x4c   :  { %292 = vmatprep.subr.bf16.mxu0 %v903_v0  ;;  %443 = vmatprep.subr.bf16.mxu1 %v903_v0 }
  0x4f   :  { %293 = vmatpush2.bf16.msra.mxu0 %v805_v47  ;;  %444 = vmatpush2.bf16.msra.mxu1 %v806_v52 }
  0x50   :  { %605 = vmatprep.subr.bf16.mxu0 %v903_v0  ;;  %747 = vmatprep.subr.bf16.mxu1 %v903_v0 }
  0x52   :  { %295 = vmatmul.mubr.bf16.vlgmr.msra.gmra.mxu0 %v133_v54  ;;  %446 = vmatmul.mubr.bf16.vlgmr.msra.gmra.mxu1 %v689_v32  ;;  %v510_v32 = vsel %vm502_vm3, %v504_v30, %v509_v31 }
  0x53   :  { %606 = vmatpush1.bf16.msra.mxu0 %v812_v55  ;;  %760 = vmatpush1.bf16.msra.mxu1 %v812_v55 }
  0x54   :  { %607 = vmatprep.subr.bf16.mxu0 %v903_v0  ;;  %748 = vmatprep.subr.bf16.mxu1 %v903_v0 }
  0x55   :  { %727 = vmatprep.mubr.msk.bf16.mxu1 %vm248_vm0, %v947_v21  ;;  %709 = vmatprep.mubr.msk.bf16.mxu0 %vm248_vm0, %v161_v60  ;;  %v819_v21 = vld [vmem:[#allocation5 + $0xd0] sm:$0xff]  }
  0x57   :  { %608 = vmatpush1.bf16.msra.mxu0 %v813_v59  ;;  %761 = vmatpush1.bf16.msra.mxu1 %v813_v59 }
  0x58   :  { %609 = vmatprep.subr.bf16.mxu0 %v903_v0  ;;  %749 = vmatprep.subr.bf16.mxu1 %v903_v0 }
  0x5a   :  { %303 = vmatmul.mubr.bf16.gmra.mxu0 %v153_v3  ;;  %454 = vmatmul.mubr.bf16.gmra.mxu1 %v961_v37 }
  0x5b   :  { %610 = vmatpush1.bf16.msra.mxu0 %v814_v2  ;;  %762 = vmatpush1.bf16.msra.mxu1 %v814_v2 }
  0x5c   :  { %611 = vmatprep.subr.bf16.mxu0 %v903_v0  ;;  %750 = vmatprep.subr.bf16.mxu1 %v903_v0 }
  0x5d   :  { %728 = vmatprep.mubr.msk.bf16.mxu1 %vm248_vm0, %v712_v5  ;;  %710 = vmatprep.mubr.msk.bf16.mxu0 %vm248_vm0, %v167_v6 }
  0x5f   :  { %612 = vmatpush1.bf16.msra.mxu0 %v815_v9  ;;  %763 = vmatpush1.bf16.msra.mxu1 %v815_v9 }
  0x60   :  { %613 = vmatprep.subr.bf16.mxu0 %v903_v0  ;;  %751 = vmatprep.subr.bf16.mxu1 %v903_v0 }
  0x62   :  { %311 = vmatmul.mubr.bf16.gmra.mxu0 %v164_v10  ;;  %462 = vmatmul.mubr.bf16.gmra.mxu1 %v711_v14 }
  0x63   :  { %614 = vmatpush1.bf16.msra.mxu0 %v816_v13  ;;  %764 = vmatpush1.bf16.msra.mxu1 %v816_v13 }
  0x64   :  { %615 = vmatprep.subr.bf16.mxu0 %v903_v0  ;;  %752 = vmatprep.subr.bf16.mxu1 %v903_v0 }
  0x65   :  { %744 = vmatprep.mubr.msk.bf16.mxu0 %vm248_vm0, %v508_v16  ;;  %745 = vmatprep.mubr.msk.bf16.mxu1 %vm248_vm0, %v512_v19 }
  0x67   :  { %616 = vmatpush1.bf16.msra.mxu0 %v817_v17  ;;  %765 = vmatpush1.bf16.msra.mxu1 %v817_v17 }
  0x68   :  { %617 = vmatprep.subr.bf16.mxu0 %v903_v0  ;;  %753 = vmatprep.subr.bf16.mxu1 %v903_v0 }
  0x6b   :  { %618 = vmatpush1.bf16.msra.mxu0 %v818_v20  ;;  %766 = vmatpush1.bf16.msra.mxu1 %v818_v20 }
  0x6c   :  { %619 = vmatprep.subr.bf16.mxu0 %v903_v0  ;;  %754 = vmatprep.subr.bf16.mxu1 %v903_v0 }
  0x6f   :  { %620 = vmatpush1.bf16.msra.mxu0 %v819_v21  ;;  %767 = vmatpush1.bf16.msra.mxu1 %v819_v21 }
  0x70   :  { %627 = vmatprep.subr.bf16.mxu0 %v903_v0  ;;  %755 = vmatprep.subr.bf16.mxu1 %v903_v0 }
  0x73   :  { %628 = vmatpush2.bf16.msra.mxu0 %v603_v23  ;;  %768 = vmatpush2.bf16.msra.mxu1 %v603_v23 }
  0x74   :  { %629 = vmatprep.subr.bf16.mxu0 %v903_v0  ;;  %756 = vmatprep.subr.bf16.mxu1 %v903_v0 }
  0x77   :  { %630 = vmatpush2.bf16.msra.mxu0 %v824_v24  ;;  %769 = vmatpush2.bf16.msra.mxu1 %v824_v24 }
  0x78   :  { %631 = vmatprep.subr.bf16.mxu0 %v903_v0  ;;  %757 = vmatprep.subr.bf16.mxu1 %v903_v0 }
  0x7b   :  { %632 = vmatpush2.bf16.msra.mxu0 %v826_v25  ;;  %770 = vmatpush2.bf16.msra.mxu1 %v826_v25 }
  0x7c   :  { %633 = vmatprep.subr.bf16.mxu0 %v903_v0  ;;  %758 = vmatprep.subr.bf16.mxu1 %v903_v0 }
  0x7f   :  { %634 = vmatpush2.bf16.msra.mxu0 %v827_v26  ;;  %771 = vmatpush2.bf16.msra.mxu1 %v827_v26 }
  0x80   :  { %635 = vmatprep.subr.bf16.mxu0 %v903_v0  ;;  %759 = vmatprep.subr.bf16.mxu1 %v903_v0 }
  0x83   :  { %636 = vmatpush2.bf16.msra.mxu0 %v828_v28  ;;  %772 = vmatpush2.bf16.msra.mxu1 %v828_v28 }
  0x86   :  { %638 = vmatmul.mubr.bf16.vlgmr.msra.gmra.mxu0 %v505_v18  ;;  %646 = vmatmul.mubr.bf16.vlgmr.msra.gmra.mxu1 %v510_v32 }
  0x87   :  { %746 = vmatprep.mubr.msk.bf16.mxu1 %vm248_vm0, %v511_v15 }
  0x8e   :  { %654 = vmatmul.mubr.bf16.gmra.mxu1 %v509_v31 }
 0x112   :  { %v296_v33 = vpop.f32.mrf.mxu0  ;;  %v447_v34 = vpop.f32.mrf.mxu1 }
 0x113   :  { %v448_v56 = vadd.f32 %v447_v34, %v296_v33 }
 0x114   :  { %v298_v35 = vpop.f32.mrf.mxu0  ;;  %v449_v36 = vpop.f32.mrf.mxu1 }
 0x116   :  { %v299_v37 = vpop.f32.mrf.mxu0  ;;  %v450_v38 = vpop.f32.mrf.mxu1 }
 0x117   :  { %v451_v63 = vadd.f32 %v450_v38, %v299_v37 }
 0x118   :  { %v301_v39 = vpop.f32.mrf.mxu0  ;;  %v452_v40 = vpop.f32.mrf.mxu1 }
 0x11a   :  { %v304_v0 = vpop.f32.mrf.mxu0  ;;  %v455_v41 = vpop.f32.mrf.mxu1 }
 0x11b   :  { %v456_v57 = vadd.f32 %v455_v41, %v304_v0 }
 0x11c   :  { %v306_v42 = vpop.f32.mrf.mxu0  ;;  %v457_v43 = vpop.f32.mrf.mxu1 }
 0x11e   :  { %v307_v44 = vpop.f32.mrf.mxu0  ;;  %v458_v45 = vpop.f32.mrf.mxu1 }
 0x11f   :  { %v459_v2 = vadd.f32 %v458_v45, %v307_v44 }
 0x120   :  { %v309_v46 = vpop.f32.mrf.mxu0  ;;  %v460_v47 = vpop.f32.mrf.mxu1 }
 0x122   :  { %v312_v48 = vpop.f32.mrf.mxu0  ;;  %v463_v49 = vpop.f32.mrf.mxu1 }
 0x123   :  { %v464_v9 = vadd.f32 %v463_v49, %v312_v48 }
 0x124   :  { %v314_v50 = vpop.f32.mrf.mxu0  ;;  %v465_v51 = vpop.f32.mrf.mxu1 }
 0x126   :  { %v315_v52 = vpop.f32.mrf.mxu0  ;;  %v466_v53 = vpop.f32.mrf.mxu1 }
 0x128   :  { %v316_v54 = vpop.f32.mrf.mxu0  ;;  %v467_v55 = vpop.f32.mrf.mxu1 }
 0x146   :  { %v639_v58 = vpop.f32.mrf.mxu0  ;;  %v647_v60 = vpop.f32.mrf.mxu1 }
 0x147   :  { %v661_v59 = vadd.f32 %v639_v58, %v448_v56  ;;  %v663_v61 = vadd.f32 %v647_v60, %v456_v57 }
 0x148   :  { %v641_v62 = vpop.f32.mrf.mxu0  ;;  %v649_v1 = vpop.f32.mrf.mxu1 }
 0x149   :  { %666 = vst [vmem:[#allocation7] sm:$0xff] %v661_v59  ;;  %668 = vst [vmem:[#allocation7 + $0x10] sm:$0xff] %v663_v61 }
 0x14a   :  { %v642_v3 = vpop.f32.mrf.mxu0  ;;  %v650_v5 = vpop.f32.mrf.mxu1 }
 0x14b   :  { %v662_v4 = vadd.f32 %v642_v3, %v451_v63  ;;  %v664_v6 = vadd.f32 %v650_v5, %v459_v2 }
 0x14c   :  { %v644_v7 = vpop.f32.mrf.mxu0  ;;  %v652_v8 = vpop.f32.mrf.mxu1 }
 0x14d   :  { %667 = vst [vmem:[#allocation7 + $0x8] sm:$0xff] %v662_v4  ;;  %669 = vst [vmem:[#allocation7 + $0x18] sm:$0xff] %v664_v6 }
 0x14e   :  { %v655_v10 = vpop.f32.mrf.mxu1 }
 0x14f   :  { %v665_v11 = vadd.f32 %v655_v10, %v464_v9 }
 0x150   :  { %v657_v12 = vpop.f32.mrf.mxu1 }
 0x151   :  { %670 = vst [vmem:[#allocation7 + $0x20] sm:$0x3] %v665_v11 }
 0x152   :  { %v658_v13 = vpop.f32.mrf.mxu1 }
 0x153   :  { %882 = shalt.err (!%p879_p0)
}
 0x154   :  { %682 = dma.vmem_to_hbm [thread:$0]  %s677_s1, 640, %s1041_s2, [#allocation4], %s898_s12, %s898_s12, %s899_s13   ;;  %v659_v14 = vpop.f32.mrf.mxu1 }
 0x155   :  { %895 = dma.done.wait [#allocation4], 640  }
 0x156   :  { %896 = vsyncadd [#allocation4], 4294966656 }
 0x157   :  { %686 = vsyncpa [#allocation3], 1 }
 0x158   :  { %687 = vsyncpa [#allocation6], 1 }
 0x159   :  { %688 = vsyncpa [#allocation4], 1 }

</bundles_post_ra>
